<compile_context>
chip_gen: v7x
topology: tpu7x:2x2x1
jax: 0.10.0
libtpu: 0.0.40
codegen_flags: <defaults>
</compile_context>

<pallas_src>
import math

import jax
import jax.numpy as jnp
from jax.experimental import pallas as pl
from jax.experimental.pallas import tpu as pltpu


def _sage_kernel(feat_ref, neigh_ref, adj_ref, wn_t_ref, wself_t_ref, wnbr_t_ref,
                 out_ref, acc_ref, deg_ref):
    k = pl.program_id(1)

    @pl.when(k == 0)
    def _init():
        acc_ref[...] = jnp.zeros_like(acc_ref)
        deg_ref[...] = jnp.zeros_like(deg_ref)

    # adj tile is bf16 in HBM (exact for 0/1 adjacency); compute in f32.
    adj = adj_ref[...].astype(jnp.float32)                       # (tm, tk)

    # Tiled K-reduction of adj @ neigh_feats (MXU, f32 accumulate).
    acc_ref[...] += jnp.dot(adj, neigh_ref[...],
                            preferred_element_type=jnp.float32)  # (tm, F_in)

    # Degree partial sums folded into the same adj pass (XLU cross-lane reduce),
    # so adj is streamed from HBM exactly once.
    deg_ref[...] += jnp.sum(adj, axis=1, keepdims=True)          # (tm, 1)

    @pl.when(k == pl.num_programs(1) - 1)
    def _finalize():
        d = deg_ref[...] + 1.0
        # EUP approximate reciprocal + one Newton step: off the exact-divide
        # path, but keeps the result within tight f32 tolerance.
        inv = pl.reciprocal(d, approx=True)
        inv = inv * (2.0 - d * inv)

        h = acc_ref[...] * inv                                   # (tm, F_in)
        # neigh_linear applied once per row tile (weights pre-transposed).
        h = jnp.dot(h, wn_t_ref[...], preferred_element_type=jnp.float32)

        # linear over cat([features, h], -1) == feat @ W_self.T + h @ W_nbr.T
        z = jnp.dot(feat_ref[...], wself_t_ref[...],
                    preferred_element_type=jnp.float32)
        z = z + jnp.dot(h, wnbr_t_ref[...],
                        preferred_element_type=jnp.float32)
        out_ref[...] = z.astype(out_ref.dtype)


def _round_up(x, m):
    return ((x + m - 1) // m) * m


def _pad2(x, rows, cols):
    pr, pc = rows - x.shape[0], cols - x.shape[1]
    if pr == 0 and pc == 0:
        return x
    return jnp.pad(x, ((0, pr), (0, pc)))


def sage_conv_layer(features, adj, w_neigh, w_lin, neigh_feats=None,
                    *, tm_target=256, tk_target=512):
    """Pallas implementation of SageConvLayer.forward (dense 2-D adj)."""
    N, F_in = features.shape
    F_out = w_lin.shape[0]
    assert adj.shape == (N, N)
    assert w_neigh.shape == (F_in, F_in)
    assert w_lin.shape == (F_out, 2 * F_in)

    share_neigh = neigh_feats is None

    # ---- padding / tiling choices -------------------------------------------
    F_in_p = _round_up(F_in, 128)
    F_out_p = _round_up(F_out, 128)

    n128 = _round_up(N, 128)
    tm = min(tm_target, n128)           # node-row tile  (kept modest for v7x 64MiB VMEM)
    tk = min(tk_target, n128)           # adj reduction-column tile
    n_pad = _round_up(n128, math.lcm(tm, tk))

    # ---- host-side layout plumbing (free, done once in HBM) -----------------
    feat_p = _pad2(features.astype(jnp.float32), n_pad, F_in_p)
    if share_neigh:
        neigh_p = feat_p                # reuse same HBM buffer, no duplicate copy
    else:
        neigh_p = _pad2(neigh_feats.astype(jnp.float32), n_pad, F_in_p)

    # bf16 adjacency: exact for 0/1 (or low-precision normalized) adjacency,
    # halves the dominant HBM traffic.
    adj_p = _pad2(adj, n_pad, n_pad).astype(jnp.bfloat16)

    # Pre-transposed (in, out)-major weights: no in-kernel transposes.
    wn_t = _pad2(w_neigh.T.astype(jnp.float32), F_in_p, F_in_p)
    wself_t = _pad2(w_lin[:, :F_in].T.astype(jnp.float32), F_in_p, F_out_p)
    wnbr_t = _pad2(w_lin[:, F_in:].T.astype(jnp.float32), F_in_p, F_out_p)

    grid = (n_pad // tm, n_pad // tk)   # (parallel rows, arbitrary reduction)

    cost = pl.CostEstimate(
        flops=int(2 * n_pad * n_pad * F_in_p
                  + 2 * n_pad * F_in_p * F_in_p
                  + 4 * n_pad * F_in_p * F_out_p),
        transcendentals=int(n_pad),
        bytes_accessed=int(adj_p.size * 2
                           + feat_p.size * 4
                           + grid[0] * neigh_p.size * 4
                           + n_pad * F_out_p * 4
                           + (wn_t.size + wself_t.size + wnbr_t.size) * 4),
    )

    out_p = pl.pallas_call(
        _sage_kernel,
        out_shape=jax.ShapeDtypeStruct((n_pad, F_out_p), jnp.float32),
        grid=grid,
        in_specs=[
            pl.BlockSpec((tm, F_in_p), lambda i, k: (i, 0)),     # features (resident over k)
            pl.BlockSpec((tk, F_in_p), lambda i, k: (k, 0)),     # neigh feats (streams over k)
            pl.BlockSpec((tm, tk), lambda i, k: (i, k)),         # adj tile
            pl.BlockSpec((F_in_p, F_in_p), lambda i, k: (0, 0)),  # W_neigh.T
            pl.BlockSpec((F_in_p, F_out_p), lambda i, k: (0, 0)),  # W_self.T
            pl.BlockSpec((F_in_p, F_out_p), lambda i, k: (0, 0)),  # W_nbr.T
        ],
        out_specs=pl.BlockSpec((tm, F_out_p), lambda i, k: (i, 0)),
        scratch_shapes=[
            pltpu.VMEM((tm, F_in_p), jnp.float32),               # adj@neigh accumulator
            pltpu.VMEM((tm, 1), jnp.float32),                    # degree partial sums
        ],
        compiler_params=pltpu.CompilerParams(
            dimension_semantics=("parallel", "arbitrary")),
        cost_estimate=cost,
    )(feat_p, neigh_p, adj_p, wn_t, wself_t, wnbr_t)

    return out_p[:N, :F_out]


def _xavier_uniform(key, shape, gain):
    # torch.nn.init.xavier_uniform_ on a (fan_out, fan_in) Linear weight
    fan_out, fan_in = shape
    bound = gain * math.sqrt(6.0 / (fan_in + fan_out))
    return jax.random.uniform(key, shape, jnp.float32, minval=-bound, maxval=bound)


def _reference(features, adj, w_neigh, w_lin, neigh_feats=None):
    if neigh_feats is None:
        neigh_feats = features
    h = neigh_feats @ w_neigh.T
    h = (adj @ h) / (adj.sum(axis=1, keepdims=True) + 1.0)
    return jnp.concatenate([features, h], axis=-1) @ w_lin.T


if __name__ == "__main__":
    key = jax.random.PRNGKey(0)
    k_feat, k_adj, k_wn, k_wl = jax.random.split(key, 4)

    N = 16           # number of nodes
    in_features = 32
    out_features = 32
    gain = math.sqrt(2.0)  # nn.init.calculate_gain('relu')

    features = jax.random.normal(k_feat, (N, in_features), jnp.float32)
    adj = (jax.random.uniform(k_adj, (N, N)) < 0.3).astype(jnp.float32)

    w_neigh = _xavier_uniform(k_wn, (in_features, in_features), gain)
    w_lin = _xavier_uniform(k_wl, (out_features, 2 * in_features), gain)

    out = sage_conv_layer(features, adj, w_neigh, w_lin)
    out = jax.block_until_ready(out)

    ref = _reference(features, adj, w_neigh, w_lin)
    assert out.shape == (N, out_features)
    # Tolerance covers the EUP approximate-reciprocal (+ Newton step) degree
    # normalization; everything else is exact f32.
    assert jnp.allclose(out, ref, atol=1e-3, rtol=1e-3), "mismatch vs reference"
    print("KERNEL_OK")
</pallas_src>

<mosaic_0001>
module attributes {stable_mosaic.version = 11 : i64} {
  func.func @_sage_kernel(%arg0: i32, %arg1: i32, %arg2: memref<128x128xf32, #tpu.memory_space<vmem>>, %arg3: memref<128x128xf32, #tpu.memory_space<vmem>>, %arg4: memref<128x128xbf16, #tpu.memory_space<vmem>>, %arg5: memref<128x128xf32, #tpu.memory_space<vmem>>, %arg6: memref<128x128xf32, #tpu.memory_space<vmem>>, %arg7: memref<128x128xf32, #tpu.memory_space<vmem>>, %arg8: memref<128x128xf32, #tpu.memory_space<vmem>>, %arg9: memref<128x128xf32, #tpu.memory_space<vmem>>, %arg10: memref<128x1xf32, #tpu.memory_space<vmem>>) attributes {dimension_semantics = [#tpu.dimension_semantics<parallel>, #tpu.dimension_semantics<arbitrary>], iteration_bounds = array<i64: 1, 1>, scalar_prefetch = 0 : i64, scratch_operands = 2 : i64, tpu.core_type = #tpu.core_type<tc>, window_params = [{transform_indices = @transform_0, window_bounds = array<i64: 128, 128>}, {transform_indices = @transform_1, window_bounds = array<i64: 128, 128>}, {transform_indices = @transform_2, window_bounds = array<i64: 128, 128>}, {pipeline_mode = #tpu.pipeline_mode<synchronous>, transform_indices = @transform_3, window_bounds = array<i64: 128, 128>}, {pipeline_mode = #tpu.pipeline_mode<synchronous>, transform_indices = @transform_4, window_bounds = array<i64: 128, 128>}, {pipeline_mode = #tpu.pipeline_mode<synchronous>, transform_indices = @transform_5, window_bounds = array<i64: 128, 128>}, {transform_indices = @transform_6, window_bounds = array<i64: 128, 128>}]} {
    %c0_i32 = arith.constant 0 : i32
    %0 = arith.cmpi eq, %arg1, %c0_i32 : i32
    %1 = arith.extui %0 : i1 to i32
    %c0_i32_0 = arith.constant 0 : i32
    %2 = arith.cmpi ne, %1, %c0_i32_0 : i32
    scf.if %2 {
      %cst_15 = arith.constant 0.000000e+00 : f32
      %18 = vector.broadcast %cst_15 : f32 to vector<128x128xf32>
      %c0_16 = arith.constant 0 : index
      %c0_17 = arith.constant 0 : index
      %19 = vector.load %arg9[%c0_16, %c0_17] : memref<128x128xf32, #tpu.memory_space<vmem>>, vector<128x128xf32>
      tpu.vector_store %arg9[%c0_16, %c0_17], %18 {strides = array<i32>} : memref<128x128xf32, #tpu.memory_space<vmem>>, vector<128x128xf32>,
      %cst_18 = arith.constant 0.000000e+00 : f32
      %20 = vector.broadcast %cst_18 : f32 to vector<128x1xf32>
      %c0_19 = arith.constant 0 : index
      %c0_20 = arith.constant 0 : index
      %21 = vector.load %arg10[%c0_19, %c0_20] : memref<128x1xf32, #tpu.memory_space<vmem>>, vector<128x1xf32>
      tpu.vector_store %arg10[%c0_19, %c0_20], %20 {strides = array<i32>} : memref<128x1xf32, #tpu.memory_space<vmem>>, vector<128x1xf32>,
    } else {
    }
    %c0 = arith.constant 0 : index
    %c0_1 = arith.constant 0 : index
    %3 = vector.load %arg4[%c0, %c0_1] : memref<128x128xbf16, #tpu.memory_space<vmem>>, vector<128x128xbf16>
    %4 = arith.extf %3 : vector<128x128xbf16> to vector<128x128xf32>
    %c0_2 = arith.constant 0 : index
    %c0_3 = arith.constant 0 : index
    %5 = vector.load %arg9[%c0_2, %c0_3] : memref<128x128xf32, #tpu.memory_space<vmem>>, vector<128x128xf32>
    %c0_4 = arith.constant 0 : index
    %c0_5 = arith.constant 0 : index
    %6 = vector.load %arg3[%c0_4, %c0_5] : memref<128x128xf32, #tpu.memory_space<vmem>>, vector<128x128xf32>
    %cst = arith.constant dense<0.000000e+00> : vector<128x128xf32>
    %7 = tpu.matmul %4, %6, %cst {dimension_numbers = #tpu.dot_dimension_numbers<[1], [0], [0], [1], [0, 0, 1, 1], [], []>} : vector<128x128xf32>, vector<128x128xf32>, vector<128x128xf32> -> vector<128x128xf32>
    %8 = arith.addf %5, %7 : vector<128x128xf32>
    %c0_6 = arith.constant 0 : index
    %c0_7 = arith.constant 0 : index
    %9 = vector.load %arg9[%c0_6, %c0_7] : memref<128x128xf32, #tpu.memory_space<vmem>>, vector<128x128xf32>
    tpu.vector_store %arg9[%c0_6, %c0_7], %8 {strides = array<i32>} : memref<128x128xf32, #tpu.memory_space<vmem>>, vector<128x128xf32>,
    %c0_8 = arith.constant 0 : index
    %c0_9 = arith.constant 0 : index
    %10 = vector.load %arg10[%c0_8, %c0_9] : memref<128x1xf32, #tpu.memory_space<vmem>>, vector<128x1xf32>
    %cst_10 = arith.constant dense<0.000000e+00> : vector<128xf32>
    %11 = vector.multi_reduction <add>, %4, %cst_10 [1] : vector<128x128xf32> to vector<128xf32>
    %12 = vector.shape_cast %11 : vector<128xf32> to vector<128x1xf32>
    %13 = arith.addf %10, %12 : vector<128x1xf32>
    %c0_11 = arith.constant 0 : index
    %c0_12 = arith.constant 0 : index
    %14 = vector.load %arg10[%c0_11, %c0_12] : memref<128x1xf32, #tpu.memory_space<vmem>>, vector<128x1xf32>
    tpu.vector_store %arg10[%c0_11, %c0_12], %13 {strides = array<i32>} : memref<128x1xf32, #tpu.memory_space<vmem>>, vector<128x1xf32>,
    %c0_i32_13 = arith.constant 0 : i32
    %15 = arith.cmpi eq, %arg1, %c0_i32_13 : i32
    %16 = arith.extui %15 : i1 to i32
    %c0_i32_14 = arith.constant 0 : i32
    %17 = arith.cmpi ne, %16, %c0_i32_14 : i32
    scf.if %17 {
      %c0_15 = arith.constant 0 : index
      %c0_16 = arith.constant 0 : index
      %18 = vector.load %arg10[%c0_15, %c0_16] : memref<128x1xf32, #tpu.memory_space<vmem>>, vector<128x1xf32>
      %cst_17 = arith.constant 1.000000e+00 : f32
      %19 = vector.broadcast %cst_17 : f32 to vector<128x1xf32>
      %20 = arith.addf %18, %19 : vector<128x1xf32>
      %21 = tpu.reciprocal %20 {approx = true} : vector<128x1xf32> -> vector<128x1xf32>
      %22 = arith.mulf %20, %21 : vector<128x1xf32>
      %cst_18 = arith.constant 2.000000e+00 : f32
      %23 = vector.broadcast %cst_18 : f32 to vector<128x1xf32>
      %24 = arith.subf %23, %22 : vector<128x1xf32>
      %25 = arith.mulf %21, %24 : vector<128x1xf32>
      %c0_19 = arith.constant 0 : index
      %c0_20 = arith.constant 0 : index
      %26 = vector.load %arg9[%c0_19, %c0_20] : memref<128x128xf32, #tpu.memory_space<vmem>>, vector<128x128xf32>
      %27 = vector.broadcast %25 : vector<128x1xf32> to vector<128x128xf32>
      %28 = arith.mulf %26, %27 : vector<128x128xf32>
      %c0_21 = arith.constant 0 : index
      %c0_22 = arith.constant 0 : index
      %29 = vector.load %arg5[%c0_21, %c0_22] : memref<128x128xf32, #tpu.memory_space<vmem>>, vector<128x128xf32>
      %cst_23 = arith.constant dense<0.000000e+00> : vector<128x128xf32>
      %30 = tpu.matmul %28, %29, %cst_23 {dimension_numbers = #tpu.dot_dimension_numbers<[1], [0], [0], [1], [0, 0, 1, 1], [], []>} : vector<128x128xf32>, vector<128x128xf32>, vector<128x128xf32> -> vector<128x128xf32>
      %c0_24 = arith.constant 0 : index
      %c0_25 = arith.constant 0 : index
      %31 = vector.load %arg2[%c0_24, %c0_25] : memref<128x128xf32, #tpu.memory_space<vmem>>, vector<128x128xf32>
      %c0_26 = arith.constant 0 : index
      %c0_27 = arith.constant 0 : index
      %32 = vector.load %arg6[%c0_26, %c0_27] : memref<128x128xf32, #tpu.memory_space<vmem>>, vector<128x128xf32>
      %cst_28 = arith.constant dense<0.000000e+00> : vector<128x128xf32>
      %33 = tpu.matmul %31, %32, %cst_28 {dimension_numbers = #tpu.dot_dimension_numbers<[1], [0], [0], [1], [0, 0, 1, 1], [], []>} : vector<128x128xf32>, vector<128x128xf32>, vector<128x128xf32> -> vector<128x128xf32>
      %c0_29 = arith.constant 0 : index
      %c0_30 = arith.constant 0 : index
      %34 = vector.load %arg7[%c0_29, %c0_30] : memref<128x128xf32, #tpu.memory_space<vmem>>, vector<128x128xf32>
      %cst_31 = arith.constant dense<0.000000e+00> : vector<128x128xf32>
      %35 = tpu.matmul %30, %34, %cst_31 {dimension_numbers = #tpu.dot_dimension_numbers<[1], [0], [0], [1], [0, 0, 1, 1], [], []>} : vector<128x128xf32>, vector<128x128xf32>, vector<128x128xf32> -> vector<128x128xf32>
      %36 = arith.addf %33, %35 : vector<128x128xf32>
      %c0_32 = arith.constant 0 : index
      %c0_33 = arith.constant 0 : index
      %37 = vector.load %arg8[%c0_32, %c0_33] : memref<128x128xf32, #tpu.memory_space<vmem>>, vector<128x128xf32>
      tpu.vector_store %arg8[%c0_32, %c0_33], %36 {strides = array<i32>} : memref<128x128xf32, #tpu.memory_space<vmem>>, vector<128x128xf32>,
    } else {
    }
    return
  }
  func.func @transform_0(%arg0: i32, %arg1: i32) -> (i32, i32) {
    %c0_i32 = arith.constant 0 : i32
    %c0_i32_0 = arith.constant 0 : i32
    return %arg0, %c0_i32 : i32, i32
  }
  func.func @transform_1(%arg0: i32, %arg1: i32) -> (i32, i32) {
    %c0_i32 = arith.constant 0 : i32
    %c0_i32_0 = arith.constant 0 : i32
    return %arg1, %c0_i32 : i32, i32
  }
  func.func @transform_2(%arg0: i32, %arg1: i32) -> (i32, i32) {
    %c0_i32 = arith.constant 0 : i32
    return %arg0, %arg1 : i32, i32
  }
  func.func @transform_3(%arg0: i32, %arg1: i32) -> (i32, i32) {
    %c0_i32 = arith.constant 0 : i32
    %c0_i32_0 = arith.constant 0 : i32
    %c0_i32_1 = arith.constant 0 : i32
    return %c0_i32, %c0_i32_0 : i32, i32
  }
  func.func @transform_4(%arg0: i32, %arg1: i32) -> (i32, i32) {
    %c0_i32 = arith.constant 0 : i32
    %c0_i32_0 = arith.constant 0 : i32
    %c0_i32_1 = arith.constant 0 : i32
    return %c0_i32, %c0_i32_0 : i32, i32
  }
  func.func @transform_5(%arg0: i32, %arg1: i32) -> (i32, i32) {
    %c0_i32 = arith.constant 0 : i32
    %c0_i32_0 = arith.constant 0 : i32
    %c0_i32_1 = arith.constant 0 : i32
    return %c0_i32, %c0_i32_0 : i32, i32
  }
  func.func @transform_6(%arg0: i32, %arg1: i32) -> (i32, i32) {
    %c0_i32 = arith.constant 0 : i32
    %c0_i32_0 = arith.constant 0 : i32
    return %arg0, %c0_i32 : i32, i32
  }
}

</mosaic_0001>

<bundles_post_ra>
// kernel: tpu_custom_call.1
= control target key start
LH: loop header
LB: loop body
LE: loop exit
PB: predicated region body
PF: predicated region fallthrough
CT: control target
= control target key end

     0   :  { %11 = vsyncpa [#allocation5], 0  ;;  %s2212_s0 = inlined_call_operand.hbm [shape: f32[128,128], index: 0, kind: input, shape index: {}]   ;;  %s2213_s1 = inlined_call_operand.hbm [shape: f32[128,128], index: 1, kind: input, shape index: {}]   ;;  %s2214_s2 = inlined_call_operand.hbm [shape: bf16[128,128], index: 2, kind: input, shape index: {}]   ;;  %s2215_s3 = inlined_call_operand.hbm [shape: f32[128,128], index: 3, kind: input, shape index: {}]   ;;  %s2216_s4 = inlined_call_operand.hbm [shape: f32[128,128], index: 4, kind: input, shape index: {}]   ;;  %s2217_s5 = inlined_call_operand.hbm [shape: f32[128,128], index: 5, kind: input, shape index: {}]   ;;  %s2218_s6 = inlined_call_operand.hbm [shape: f32[128,128], index: 6, kind: output, shape index: {}]  }
   0x1   :  { %12 = vsyncpa [#allocation8], 0 }
   0x2   :  { %13 = vsyncpa [#allocation11], 0 }
   0x3   :  { %14 = vsyncpa [#allocation14], 0 }
   0x4   :  { %15 = vsyncpa [#allocation6], 0  ;;  %s1957_s21 = smov [#allocation7]   ;;  %s1958_s23 = smov [#allocation10]  }
   0x5   :  { %s33_s22 = sshll.u32 %s1957_s21, 4  ;;  %s57_s24 = sshll.u32 %s1958_s23, 4  ;;  %s34_s22 = int_to_ptr.vmem [resolvable:$true] %s33_s22  ;;  %s2005_s24 = int_to_ptr.vmem [resolvable:$true] %s57_s24 }
   0x6   :  { %s1793_s27 = scalar_lea.hbm %s2213_s1, 2048 }
   0x7   :  { %p1794_p0 = scmp.ne.s32.totalorder %s2213_s1, %s1793_s27  ;;  %p1797_p1 = scmp.lt.u32.totalorder %s1793_s27, %s2213_s1 }
   0x9   :  { %p1799_p2 = pnand %p1797_p1, %p1794_p0 }
   0xb   :  { %1802 = shalt.err (!%p1799_p2)
}
   0xc   :  { %s1803_s8 = scalar_lea.vmem %s34_s22, 2048  ;;  %p1808_p4 = scmp.lt.s32.totalorder %s34_s22, %s34_s22 }
   0xd   :  { %p1804_p3 = scmp.ne.s32.totalorder %s34_s22, %s1803_s8  ;;  %p1809_p5 = scmp.lt.s32.totalorder %s1803_s8, %s1803_s8 }
   0xf   :  { %p1810_p6 = por %p1809_p5, %p1808_p4 }
  0x11   :  { %p1811_p7 = pnand %p1810_p6, %p1804_p3 }
  0x13   :  { %1814 = shalt.err (!%p1811_p7)
}
  0x14   :  { %s1959_s9 = smov 128   ;;  %s1960_s10 = smov 8  }
  0x15   :  { %39 = dma.hbm_to_vmem [thread:$0]  %s2213_s1, 2048, %s34_s22, [#allocation8], %s1959_s9, %s1959_s9, %s1960_s10  }
  0x16   :  { %s1815_s15 = scalar_lea.hbm %s2215_s3, 2048 }
  0x17   :  { %p1816_p8 = scmp.ne.s32.totalorder %s2215_s3, %s1815_s15  ;;  %p1819_p9 = scmp.lt.u32.totalorder %s1815_s15, %s2215_s3 }
  0x19   :  { %p1821_p10 = pnand %p1819_p9, %p1816_p8 }
  0x1b   :  { %1824 = shalt.err (!%p1821_p10)
}
  0x1c   :  { %s1825_s20 = scalar_lea.vmem %s2005_s24, 2048  ;;  %p1830_p12 = scmp.lt.s32.totalorder %s2005_s24, %s2005_s24 }
  0x1d   :  { %p1826_p11 = scmp.ne.s32.totalorder %s2005_s24, %s1825_s20  ;;  %p1831_p13 = scmp.lt.s32.totalorder %s1825_s20, %s1825_s20 }
  0x1f   :  { %p1832_p0 = por %p1831_p13, %p1830_p12 }
  0x21   :  { %p1833_p1 = pnand %p1832_p0, %p1826_p11 }
  0x23   :  { %1836 = shalt.err (!%p1833_p1)
}
  0x24   :  { %63 = dma.hbm_to_vmem [thread:$0]  %s2215_s3, 2048, %s2005_s24, [#allocation11], %s1959_s9, %s1959_s9, %s1960_s10  }
  0x25   :  { %s1961_s22 = smov [#allocation4]   ;;  %s1962_s25 = smov [#allocation9]  }
  0x26   :  { %s21_s23 = sshll.u32 %s1961_s22, 4  ;;  %s45_s26 = sshll.u32 %s1962_s25, 4  ;;  %s22_s23 = int_to_ptr.vmem [resolvable:$true] %s21_s23  ;;  %s2042_s26 = int_to_ptr.vmem [resolvable:$true] %s45_s26 }
  0x27   :  { %s1837_s29 = scalar_lea.hbm %s2212_s0, 2048 }
  0x28   :  { %p1838_p2 = scmp.ne.s32.totalorder %s2212_s0, %s1837_s29  ;;  %p1841_p3 = scmp.lt.u32.totalorder %s1837_s29, %s2212_s0 }
  0x2a   :  { %p1843_p4 = pnand %p1841_p3, %p1838_p2 }
  0x2c   :  { %1846 = shalt.err (!%p1843_p4)
}
  0x2d   :  { %s1847_s3 = scalar_lea.vmem %s22_s23, 2048  ;;  %p1852_p6 = scmp.lt.s32.totalorder %s22_s23, %s22_s23 }
  0x2e   :  { %p1848_p5 = scmp.ne.s32.totalorder %s22_s23, %s1847_s3  ;;  %p1853_p7 = scmp.lt.s32.totalorder %s1847_s3, %s1847_s3 }
  0x30   :  { %p1854_p8 = por %p1853_p7, %p1852_p6 }
  0x32   :  { %p1855_p9 = pnand %p1854_p8, %p1848_p5 }
  0x34   :  { %1858 = shalt.err (!%p1855_p9)
}
  0x35   :  { %27 = dma.hbm_to_vmem [thread:$0]  %s2212_s0, 2048, %s22_s23, [#allocation5], %s1959_s9, %s1959_s9, %s1960_s10  }
  0x36   :  { %s1859_s15 = scalar_lea.hbm %s2214_s2, 1024 }
  0x37   :  { %p1860_p10 = scmp.ne.s32.totalorder %s2214_s2, %s1859_s15  ;;  %p1863_p11 = scmp.lt.u32.totalorder %s1859_s15, %s2214_s2 }
  0x39   :  { %p1865_p12 = pnand %p1863_p11, %p1860_p10 }
  0x3b   :  { %1868 = shalt.err (!%p1865_p12)
}
  0x3c   :  { %s1869_s20 = scalar_lea.vmem %s2042_s26, 1024  ;;  %p1874_p0 = scmp.lt.s32.totalorder %s2042_s26, %s2042_s26 }
  0x3d   :  { %p1870_p13 = scmp.ne.s32.totalorder %s2042_s26, %s1869_s20  ;;  %p1875_p1 = scmp.lt.s32.totalorder %s1869_s20, %s1869_s20 }
  0x3f   :  { %p1876_p2 = por %p1875_p1, %p1874_p0 }
  0x41   :  { %p1877_p3 = pnand %p1876_p2, %p1870_p13 }
  0x43   :  { %1880 = shalt.err (!%p1877_p3)
}
  0x44   :  { %s1963_s0 = smov 64   ;;  %s1964_s1 = smov 4  }
  0x45   :  { %51 = dma.hbm_to_vmem [thread:$0]  %s2214_s2, 1024, %s2042_s26, [#allocation8], %s1963_s0, %s1963_s0, %s1964_s1  }
  0x46   :  { %s1965_s23 = smov [#allocation12]   ;;  %s1966_s27 = smov [#allocation13]  }
  0x47   :  { %s69_s25 = sshll.u32 %s1965_s23, 4  ;;  %s81_s28 = sshll.u32 %s1966_s27, 4  ;;  %s70_s25 = int_to_ptr.vmem [resolvable:$true] %s69_s25  ;;  %s2076_s28 = int_to_ptr.vmem [resolvable:$true] %s81_s28 }
  0x48   :  { %s1881_s7 = scalar_lea.hbm %s2216_s4, 2048 }
  0x49   :  { %p1882_p4 = scmp.ne.s32.totalorder %s2216_s4, %s1881_s7  ;;  %p1885_p5 = scmp.lt.u32.totalorder %s1881_s7, %s2216_s4 }
  0x4b   :  { %p1887_p6 = pnand %p1885_p5, %p1882_p4 }
  0x4d   :  { %1890 = shalt.err (!%p1887_p6)
}
  0x4e   :  { %s1891_s2 = scalar_lea.vmem %s70_s25, 2048  ;;  %p1896_p8 = scmp.lt.s32.totalorder %s70_s25, %s70_s25 }
  0x4f   :  { %p1892_p7 = scmp.ne.s32.totalorder %s70_s25, %s1891_s2  ;;  %p1897_p9 = scmp.lt.s32.totalorder %s1891_s2, %s1891_s2 }
  0x51   :  { %p1898_p10 = por %p1897_p9, %p1896_p8 }
  0x53   :  { %p1899_p11 = pnand %p1898_p10, %p1892_p7 }
  0x55   :  { %1902 = shalt.err (!%p1899_p11)
}
  0x56   :  { %75 = dma.hbm_to_vmem [thread:$0]  %s2216_s4, 2048, %s70_s25, [#allocation11], %s1959_s9, %s1959_s9, %s1960_s10  }
  0x57   :  { %s1903_s15 = scalar_lea.hbm %s2217_s5, 2048 }
  0x58   :  { %p1904_p12 = scmp.ne.s32.totalorder %s2217_s5, %s1903_s15  ;;  %p1907_p13 = scmp.lt.u32.totalorder %s1903_s15, %s2217_s5 }
  0x5a   :  { %p1909_p0 = pnand %p1907_p13, %p1904_p12 }
  0x5c   :  { %1912 = shalt.err (!%p1909_p0)
}
  0x5d   :  { %s1913_s20 = scalar_lea.vmem %s2076_s28, 2048  ;;  %p1918_p2 = scmp.lt.s32.totalorder %s2076_s28, %s2076_s28 }
  0x5e   :  { %p1914_p1 = scmp.ne.s32.totalorder %s2076_s28, %s1913_s20  ;;  %p1919_p3 = scmp.lt.s32.totalorder %s1913_s20, %s1913_s20 }
  0x60   :  { %p1920_p4 = por %p1919_p3, %p1918_p2 }
  0x62   :  { %p1921_p5 = pnand %p1920_p4, %p1914_p1 }
  0x64   :  { %1924 = shalt.err (!%p1921_p5)
}
  0x65   :  { %87 = dma.hbm_to_vmem [thread:$0]  %s2217_s5, 2048, %s2076_s28, [#allocation14], %s1959_s9, %s1959_s9, %s1960_s10  }
  0x66   :  { %1947 = dma.done.wait [#allocation5], 2048  }
  0x67   :  { %1948 = vsyncadd [#allocation5], 4294965248 }
  0x68   :  { %1949 = dma.done.wait [#allocation8], 3072  }
  0x69   :  { %1950 = vsyncadd [#allocation8], 4294964224 }
  0x6a   :  { %1951 = dma.done.wait [#allocation11], 4096  }
  0x6b   :  { %1952 = vsyncadd [#allocation11], 4294963200 }
  0x6c   :  { %1953 = dma.done.wait [#allocation14], 2048  }
  0x6d   :  { %1954 = vsyncadd [#allocation14], 4294965248  ;;  %vm126_vm0 = vcmask 7168   ;;  %v1967_v0 = vmov 0.0   ;;  %v2129_v1 = vld [vmem:[#allocation9 + $0x8] sm:$0xff]   ;;  %v2131_v2 = vld [vmem:[#allocation9] sm:$0xff]  }
  0x6e   :  { %129 = vst.msk [vmem:[#allocation3 + $0x10] sm:$0xff] %vm126_vm0, %v1967_v0  ;;  %127 = vst.msk [vmem:[#allocation3] sm:$0xff] %vm126_vm0, %v1967_v0  ;;  %v1217_v3 = vunpack.c.l.bf16 %v2129_v1  ;;  %v1213_v4 = vunpack.c.l.bf16 %v2131_v2  ;;  %v191_v5 = vld [vmem:[#allocation7] sm:$0xff]  ;;  %v1218_v6 = vunpack.c.h.bf16 %v2129_v1  ;;  %v1214_v7 = vunpack.c.h.bf16 %v2131_v2  ;;  %v192_v8 = vld [vmem:[#allocation7 + $0x8] sm:$0xff]  ;;  %s1969_s5 = smov [#allocation15]  }
  0x6f   :  { %128 = vst.msk [vmem:[#allocation3 + $0x8] sm:$0xff] %vm126_vm0, %v1967_v0  ;;  %130 = vst.msk [vmem:[#allocation3 + $0x18] sm:$0xff] %vm126_vm0, %v1967_v0  ;;  %v193_v9 = vld [vmem:[#allocation7 + $0x10] sm:$0xff]  ;;  %v194_v10 = vld [vmem:[#allocation7 + $0x18] sm:$0xff]  ;;  %v1602_v12 = vpack.c.bf16 %v192_v8, %v191_v5  ;;  %v1968_v49 = vmov 0   ;;  %s1196_s1 = sshll.u32 %s1969_s5, 4  ;;  %s1197_s1 = int_to_ptr.vmem [resolvable:$true] %s1196_s1 }
  0x70   :  { %131 = vst.msk [vmem:[#allocation3 + $0x20] sm:$0xff] %vm126_vm0, %v1967_v0  ;;  %132 = vst.msk [vmem:[#allocation3 + $0x28] sm:$0xff] %vm126_vm0, %v1967_v0  ;;  %404 = vadd.xlane.f32.xlu1 %v1217_v3  ;;  %400 = vadd.xlane.f32.xlu0 %v1213_v4  ;;  %v2139_v11 = vld [vmem:[#allocation9 + $0x10] sm:$0xff]   ;;  %v1606_v13 = vpack.c.bf16 %v194_v10, %v193_v9  ;;  %v195_v16 = vld [vmem:[#allocation7 + $0x20] sm:$0xff]  ;;  %s1925_s21 = scalar_lea.vmem %s1197_s1, 2048  ;;  %p1930_p7 = scmp.lt.s32.totalorder %s1197_s1, %s1197_s1 }
  0x71   :  { %133 = vst.msk [vmem:[#allocation3 + $0x30] sm:$0xff] %vm126_vm0, %v1967_v0  ;;  %134 = vst.msk [vmem:[#allocation3 + $0x38] sm:$0xff] %vm126_vm0, %v1967_v0  ;;  %1410 = vmatprep.mubr.f32.mxu1 %v1213_v4  ;;  %v1222_v14 = vunpack.c.h.bf16 %v2139_v11  ;;  %v1221_v15 = vunpack.c.l.bf16 %v2139_v11  ;;  %v196_v17 = vld [vmem:[#allocation7 + $0x28] sm:$0xff]  ;;  %v2147_v18 = vld [vmem:[#allocation9 + $0x18] sm:$0xff]   ;;  %1603 = vmatprep.subr.bf16.mxu1 %v1602_v12  ;;  %p1926_p6 = scmp.ne.s32.totalorder %s1197_s1, %s1925_s21  ;;  %p1931_p8 = scmp.lt.s32.totalorder %s1925_s21, %s1925_s21 }
  0x72   :  { %135 = vst.msk [vmem:[#allocation3 + $0x40] sm:$0xff] %vm126_vm0, %v1967_v0  ;;  %136 = vst.msk [vmem:[#allocation3 + $0x48] sm:$0xff] %vm126_vm0, %v1967_v0  ;;  %1605 = vmatpush3.bf16.msra.mxu1 %v1602_v12  ;;  %v1610_v19 = vpack.c.bf16 %v196_v17, %v195_v16  ;;  %v1226_v20 = vunpack.c.h.bf16 %v2147_v18  ;;  %v1225_v21 = vunpack.c.l.bf16 %v2147_v18  ;;  %v197_v22 = vld [vmem:[#allocation7 + $0x30] sm:$0xff]  ;;  %v198_v23 = vld [vmem:[#allocation7 + $0x38] sm:$0xff]  ;;  %1759 = vset.pattern.permute.xlu0 %v1968_v49 }
  0x73   :  { %137 = vst.msk [vmem:[#allocation3 + $0x50] sm:$0xff] %vm126_vm0, %v1967_v0  ;;  %138 = vst.msk [vmem:[#allocation3 + $0x58] sm:$0xff] %vm126_vm0, %v1967_v0  ;;  %1607 = vmatprep.subr.bf16.mxu1 %v1606_v13  ;;  %v1246_v24 = vld [vmem:[#allocation9 + $0x20] sm:$0xff]   ;;  %v1614_v25 = vpack.c.bf16 %v198_v23, %v197_v22  ;;  %v200_v29 = vld [vmem:[#allocation7 + $0x48] sm:$0xff]  ;;  %1760 = vset.pattern.permute.xlu1 %v1968_v49  ;;  %p1932_p9 = por %p1931_p8, %p1930_p7 }
  0x74   :  { %139 = vst.msk [vmem:[#allocation3 + $0x60] sm:$0xff] %vm126_vm0, %v1967_v0  ;;  %140 = vst.msk [vmem:[#allocation3 + $0x68] sm:$0xff] %vm126_vm0, %v1967_v0  ;;  %406 = vadd.xlane.f32.xlu1 %v1218_v6  ;;  %402 = vadd.xlane.f32.xlu0 %v1214_v7  ;;  %v1230_v26 = vunpack.c.h.bf16 %v1246_v24  ;;  %v1229_v27 = vunpack.c.l.bf16 %v1246_v24  ;;  %v199_v28 = vld [vmem:[#allocation7 + $0x40] sm:$0xff]  ;;  %v1247_v30 = vld [vmem:[#allocation9 + $0x28] sm:$0xff]  }
  0x75   :  { %141 = vst.msk [vmem:[#allocation3 + $0x70] sm:$0xff] %vm126_vm0, %v1967_v0  ;;  %142 = vst.msk [vmem:[#allocation3 + $0x78] sm:$0xff] %vm126_vm0, %v1967_v0  ;;  %v1618_v31 = vpack.c.bf16 %v200_v29, %v199_v28  ;;  %v1234_v32 = vunpack.c.h.bf16 %v1247_v30  ;;  %v1233_v33 = vunpack.c.l.bf16 %v1247_v30  ;;  %v201_v34 = vld [vmem:[#allocation7 + $0x50] sm:$0xff]  ;;  %v202_v35 = vld [vmem:[#allocation7 + $0x58] sm:$0xff]  ;;  %p1933_p10 = pnand %p1932_p9, %p1926_p6 }
  0x76   :  { %1609 = vmatpush3.bf16.msra.mxu1 %v1606_v13  ;;  %v1248_v36 = vld [vmem:[#allocation9 + $0x30] sm:$0xff]   ;;  %v1622_v37 = vpack.c.bf16 %v202_v35, %v201_v34  ;;  %v203_v40 = vld [vmem:[#allocation7 + $0x60] sm:$0xff]  ;;  %v204_v41 = vld [vmem:[#allocation7 + $0x68] sm:$0xff] }
  0x77   :  { %1611 = vmatprep.subr.bf16.mxu1 %v1610_v19  ;;  %v1238_v38 = vunpack.c.h.bf16 %v1248_v36  ;;  %v1237_v39 = vunpack.c.l.bf16 %v1248_v36  ;;  %v1249_v42 = vld [vmem:[#allocation9 + $0x38] sm:$0xff]   ;;  %v1626_v43 = vpack.c.bf16 %v204_v41, %v203_v40  ;;  %v205_v46 = vld [vmem:[#allocation7 + $0x70] sm:$0xff]  ;;  %v676_v50 = vld [vmem:[#allocation10] sm:$0xff] }
  0x78   :  { %410 = vadd.xlane.f32.xlu1 %v1222_v14  ;;  %408 = vadd.xlane.f32.xlu0 %v1221_v15  ;;  %v1242_v44 = vunpack.c.h.bf16 %v1249_v42  ;;  %v1241_v45 = vunpack.c.l.bf16 %v1249_v42  ;;  %v206_v47 = vld [vmem:[#allocation7 + $0x78] sm:$0xff]  ;;  %v677_v51 = vld [vmem:[#allocation10 + $0x8] sm:$0xff]  ;;  %v678_v52 = vld [vmem:[#allocation10 + $0x10] sm:$0xff] }
  0x79   :  { %v1630_v48 = vpack.c.bf16 %v206_v47, %v205_v46  ;;  %v1634_v53 = vpack.c.bf16 %v677_v51, %v676_v50  ;;  %v679_v54 = vld [vmem:[#allocation10 + $0x18] sm:$0xff]  ;;  %v680_v56 = vld [vmem:[#allocation10 + $0x20] sm:$0xff]  ;;  %v681_v57 = vld [vmem:[#allocation10 + $0x28] sm:$0xff] }
  0x7a   :  { %1613 = vmatpush3.bf16.msra.mxu1 %v1610_v19  ;;  %v1638_v55 = vpack.c.bf16 %v679_v54, %v678_v52  ;;  %v1642_v58 = vpack.c.bf16 %v681_v57, %v680_v56  ;;  %v682_v59 = vld [vmem:[#allocation10 + $0x30] sm:$0xff]  ;;  %v683_v60 = vld [vmem:[#allocation10 + $0x38] sm:$0xff]  ;;  %v684_v62 = vld [vmem:[#allocation10 + $0x40] sm:$0xff] }
  0x7b   :  { %1615 = vmatprep.subr.bf16.mxu1 %v1614_v25  ;;  %v1646_v61 = vpack.c.bf16 %v683_v60, %v682_v59  ;;  %v685_v63 = vld [vmem:[#allocation10 + $0x48] sm:$0xff]  ;;  %v686_v1 = vld [vmem:[#allocation10 + $0x50] sm:$0xff]  ;;  %v687_v2 = vld [vmem:[#allocation10 + $0x58] sm:$0xff] }
  0x7c   :  { %414 = vadd.xlane.f32.xlu1 %v1226_v20  ;;  %412 = vadd.xlane.f32.xlu0 %v1225_v21  ;;  %v1650_v0 = vpack.c.bf16 %v685_v63, %v684_v62  ;;  %v688_v4 = vld [vmem:[#allocation10 + $0x60] sm:$0xff]  ;;  %v689_v5 = vld [vmem:[#allocation10 + $0x68] sm:$0xff]  ;;  %v387_v13 = vld [vmem:[#allocation3 + $0x18] sm:$0xff] }
  0x7d   :  { %v384_v8 = vld [vmem:[#allocation3] sm:$0xff]  ;;  %v389_v19 = vld [vmem:[#allocation3 + $0x28] sm:$0xff]  ;;  %v394_v46 = vld [vmem:[#allocation3 + $0x50] sm:$0xff] }
  0x7e   :  { %1617 = vmatpush3.bf16.msra.mxu1 %v1614_v25  ;;  %v391_v25 = vld [vmem:[#allocation3 + $0x38] sm:$0xff]  ;;  %v393_v35 = vld [vmem:[#allocation3 + $0x48] sm:$0xff]  ;;  %v392_v36 = vld [vmem:[#allocation3 + $0x40] sm:$0xff] }
  0x7f   :  { %1619 = vmatprep.subr.bf16.mxu1 %v1618_v31  ;;  %v397_v54 = vld [vmem:[#allocation3 + $0x68] sm:$0xff] }
  0x80   :  { %418 = vadd.xlane.f32.xlu1 %v1230_v26  ;;  %416 = vadd.xlane.f32.xlu0 %v1229_v27 }
  0x82   :  { %1621 = vmatpush3.bf16.msra.mxu1 %v1618_v31 }
  0x83   :  { %1623 = vmatprep.subr.bf16.mxu1 %v1622_v37 }
  0x84   :  { %422 = vadd.xlane.f32.xlu1 %v1234_v32  ;;  %420 = vadd.xlane.f32.xlu0 %v1233_v33 }
  0x86   :  { %1625 = vmatpush3.bf16.msra.mxu1 %v1622_v37 }
  0x87   :  { %1627 = vmatprep.subr.bf16.mxu1 %v1626_v43 }
  0x88   :  { %426 = vadd.xlane.f32.xlu1 %v1238_v38  ;;  %424 = vadd.xlane.f32.xlu0 %v1237_v39 }
  0x8a   :  { %1629 = vmatpush3.bf16.msra.mxu1 %v1626_v43 }
  0x8b   :  { %1631 = vmatprep.subr.bf16.mxu1 %v1630_v48 }
  0x8c   :  { %430 = vadd.xlane.f32.xlu1 %v1242_v44  ;;  %428 = vadd.xlane.f32.xlu0 %v1241_v45 }
  0x8e   :  { %1633 = vmatpush3.bf16.msra.mxu1 %v1630_v48 }
  0x8f   :  { %1635 = vmatprep.subr.bf16.mxu1 %v1634_v53 }
  0x91   :  { %1411 = vmatmul.mubr.f32.vlgmr.msra.gmra.mrb[0].mxu1 %v1214_v7  ;;  %v386_v7 = vld [vmem:[#allocation3 + $0x10] sm:$0xff] }
  0x92   :  { %1413 = vmatprep.mubr.f32.mxu1 %v1217_v3  ;;  %1637 = vmatpush3.bf16.msra.mxu1 %v1634_v53  ;;  %v1654_v3 = vpack.c.bf16 %v687_v2, %v686_v1  ;;  %v399_v1 = vld [vmem:[#allocation3 + $0x78] sm:$0xff] }
  0x93   :  { %1639 = vmatprep.subr.bf16.mxu1 %v1638_v55 }
  0x95   :  { %1414 = vmatmul.mubr.f32.gmra.mrb[2].mxu1 %v1218_v6  ;;  %v1658_v6 = vpack.c.bf16 %v689_v5, %v688_v4 }
  0x96   :  { %1416 = vmatprep.mubr.f32.mxu1 %v1221_v15  ;;  %1641 = vmatpush3.bf16.msra.mxu1 %v1638_v55  ;;  %v396_v55 = vld [vmem:[#allocation3 + $0x60] sm:$0xff] }
  0x97   :  { %1643 = vmatprep.subr.bf16.mxu1 %v1642_v58 }
  0x99   :  { %1417 = vmatmul.mubr.f32.gmra.mrb[4].mxu1 %v1222_v14  ;;  %v385_v14 = vld [vmem:[#allocation3 + $0x8] sm:$0xff] }
  0x9a   :  { %1419 = vmatprep.mubr.f32.mxu1 %v1225_v21  ;;  %1645 = vmatpush3.bf16.msra.mxu1 %v1642_v58 }
  0x9b   :  { %1647 = vmatprep.subr.bf16.mxu1 %v1646_v61 }
  0x9d   :  { %1420 = vmatmul.mubr.f32.gmra.mrb[6].mxu1 %v1226_v20  ;;  %v388_v20 = vld [vmem:[#allocation3 + $0x20] sm:$0xff] }
  0x9e   :  { %1422 = vmatprep.mubr.f32.mxu1 %v1229_v27  ;;  %1649 = vmatpush3.bf16.msra.mxu1 %v1646_v61 }
  0x9f   :  { %1651 = vmatprep.subr.bf16.mxu1 %v1650_v0 }
  0xa1   :  { %1423 = vmatmul.mubr.f32.gmra.mrb[8].mxu1 %v1230_v26  ;;  %v390_v26 = vld [vmem:[#allocation3 + $0x30] sm:$0xff] }
  0xa2   :  { %1425 = vmatprep.mubr.f32.mxu1 %v1233_v33  ;;  %1653 = vmatpush3.bf16.msra.mxu1 %v1650_v0 }
  0xa3   :  { %1655 = vmatprep.subr.bf16.mxu1 %v1654_v3 }
  0xa5   :  { %1426 = vmatmul.mubr.f32.gmra.mrb[10].mxu1 %v1234_v32 }
  0xa6   :  { %1428 = vmatprep.mubr.f32.mxu1 %v1237_v39  ;;  %1657 = vmatpush3.bf16.msra.mxu1 %v1654_v3  ;;  %v398_v3 = vld [vmem:[#allocation3 + $0x70] sm:$0xff] }
  0xa7   :  { %1659 = vmatprep.subr.bf16.mxu1 %v1658_v6 }
  0xa9   :  { %1429 = vmatmul.mubr.f32.gmra.mrb[12].mxu1 %v1238_v38 }
  0xaa   :  { %1431 = vmatprep.mubr.f32.mxu1 %v1241_v45  ;;  %1661 = vmatpush3.bf16.msra.mxu1 %v1658_v6  ;;  %v395_v45 = vld [vmem:[#allocation3 + $0x58] sm:$0xff] }
  0xad   :  { %1432 = vmatmul.mubr.f32.gmra.mrb[14].mxu1 %v1242_v44 }
  0xfd   :  { %v405_v9 = vpop.xlane.xlu1 %404  ;;  %v401_v10 = vpop.xlane.xlu0 %400 }
  0xfe   :  { %v434_v11 = vadd.f32 %v405_v9, %v386_v7  ;;  %v432_v12 = vadd.f32 %v401_v10, %v384_v8 }
 0x100   :  { %451 = vst.msk [vmem:[#allocation3 + $0x10] sm:$0xff] %vm126_vm0, %v434_v11  ;;  %449 = vst.msk [vmem:[#allocation3] sm:$0xff] %vm126_vm0, %v432_v12 }
 0x101   :  { %v407_v15 = vpop.xlane.xlu1 %406  ;;  %v403_v16 = vpop.xlane.xlu0 %402 }
 0x102   :  { %v435_v17 = vadd.f32 %v407_v15, %v387_v13  ;;  %v433_v18 = vadd.f32 %v403_v16, %v385_v14 }
 0x104   :  { %452 = vst.msk [vmem:[#allocation3 + $0x18] sm:$0xff] %vm126_vm0, %v435_v17  ;;  %450 = vst.msk [vmem:[#allocation3 + $0x8] sm:$0xff] %vm126_vm0, %v433_v18 }
 0x105   :  { %v411_v21 = vpop.xlane.xlu1 %410  ;;  %v409_v22 = vpop.xlane.xlu0 %408 }
 0x106   :  { %v437_v23 = vadd.f32 %v411_v21, %v389_v19  ;;  %v436_v24 = vadd.f32 %v409_v22, %v388_v20  ;;  %v690_v20 = vld [vmem:[#allocation10 + $0x70] sm:$0xff]  ;;  %v691_v22 = vld [vmem:[#allocation10 + $0x78] sm:$0xff] }
 0x107   :  { %v468_v27 = vld [vmem:[#allocation3] sm:$0xff]  ;;  %v470_v28 = vld [vmem:[#allocation3 + $0x10] sm:$0xff] }
 0x108   :  { %454 = vst.msk [vmem:[#allocation3 + $0x28] sm:$0xff] %vm126_vm0, %v437_v23  ;;  %453 = vst.msk [vmem:[#allocation3 + $0x20] sm:$0xff] %vm126_vm0, %v436_v24  ;;  %v484_v29 = vadd.f32 1.0, %v468_v27  ;;  %v486_v30 = vadd.f32 1.0, %v470_v28  ;;  %v1662_v27 = vpack.c.bf16 %v691_v22, %v690_v20 }
 0x109   :  { %v415_v31 = vpop.xlane.xlu1 %414  ;;  %v413_v32 = vpop.xlane.xlu0 %412 }
 0x10a   :  { %v439_v33 = vadd.f32 %v415_v31, %v391_v25  ;;  %v438_v34 = vadd.f32 %v413_v32, %v390_v26  ;;  %1761 = vrcp.f32 %v484_v29  ;;  %1663 = vmatprep.subr.bf16.mxu1 %v1662_v27 }
 0x10b   :  { %v469_v37 = vld [vmem:[#allocation3 + $0x8] sm:$0xff]  ;;  %v471_v38 = vld [vmem:[#allocation3 + $0x18] sm:$0xff]  ;;  %1763 = vrcp.f32 %v486_v30  ;;  %1665 = vmatpush3.bf16.msra.mxu1 %v1662_v27 }
 0x10c   :  { %456 = vst.msk [vmem:[#allocation3 + $0x38] sm:$0xff] %vm126_vm0, %v439_v33  ;;  %455 = vst.msk [vmem:[#allocation3 + $0x30] sm:$0xff] %vm126_vm0, %v438_v34  ;;  %v485_v39 = vadd.f32 1.0, %v469_v37  ;;  %v2173_v40 = vadd.f32 1.0, %v471_v38  ;;  %v870_v27 = vld [vmem:[#allocation13 + $0x8] sm:$0xff] }
 0x10d   :  { %v419_v41 = vpop.xlane.xlu1 %418  ;;  %v417_v42 = vpop.xlane.xlu0 %416 }
 0x10e   :  { %v441_v43 = vadd.f32 %v419_v41, %v393_v35  ;;  %v440_v44 = vadd.f32 %v417_v42, %v392_v36  ;;  %1765 = vrcp.f32 %v485_v39 }
 0x10f   :  { %v472_v47 = vld [vmem:[#allocation3 + $0x20] sm:$0xff]  ;;  %1767 = vrcp.f32 %v2173_v40  ;;  %v473_v51 = vld [vmem:[#allocation3 + $0x28] sm:$0xff] }
 0x110   :  { %458 = vst.msk [vmem:[#allocation3 + $0x48] sm:$0xff] %vm126_vm0, %v441_v43  ;;  %457 = vst.msk [vmem:[#allocation3 + $0x40] sm:$0xff] %vm126_vm0, %v440_v44  ;;  %v2178_v48 = vadd.f32 1.0, %v472_v47  ;;  %v2183_v57 = vadd.f32 1.0, %v473_v51 }
 0x111   :  { %v423_v49 = vpop.xlane.xlu1 %422  ;;  %v421_v50 = vpop.xlane.xlu0 %420 }
 0x112   :  { %v443_v52 = vadd.f32 %v423_v49, %v395_v45  ;;  %v442_v53 = vadd.f32 %v421_v50, %v394_v46  ;;  %1769 = vrcp.f32 %v2178_v48 }
 0x113   :  { %v474_v61 = vld [vmem:[#allocation3 + $0x30] sm:$0xff]  ;;  %1771 = vrcp.f32 %v2183_v57  ;;  %v475_v8 = vld [vmem:[#allocation3 + $0x38] sm:$0xff] }
 0x114   :  { %v1762_v56 = vpop.eup %1761  ;;  %460 = vst.msk [vmem:[#allocation3 + $0x58] sm:$0xff] %vm126_vm0, %v443_v52  ;;  %459 = vst.msk [vmem:[#allocation3 + $0x50] sm:$0xff] %vm126_vm0, %v442_v53  ;;  %v2188_v7 = vadd.f32 1.0, %v474_v61  ;;  %v491_v19 = vadd.f32 1.0, %v475_v8 }
 0x115   :  { %v427_v58 = vpop.xlane.xlu1 %426  ;;  %v425_v59 = vpop.xlane.xlu0 %424  ;;  %v516_v60 = vmul.f32 %v1762_v56, %v484_v29 }
 0x116   :  { %v1764_v62 = vpop.eup %1763  ;;  %v445_v63 = vadd.f32 %v427_v58, %v397_v54  ;;  %v444_v0 = vadd.f32 %v425_v59, %v396_v55 }
 0x117   :  { %v532_v2 = vsub.f32 2.0, %v516_v60  ;;  %v477_v4 = vld [vmem:[#allocation3 + $0x48] sm:$0xff]  ;;  %v518_v13 = vmul.f32 %v1764_v62, %v486_v30  ;;  %v476_v26 = vld [vmem:[#allocation3 + $0x40] sm:$0xff] }
 0x118   :  { %v1766_v5 = vpop.eup %1765  ;;  %462 = vst.msk [vmem:[#allocation3 + $0x68] sm:$0xff] %vm126_vm0, %v445_v63  ;;  %461 = vst.msk [vmem:[#allocation3 + $0x60] sm:$0xff] %vm126_vm0, %v444_v0  ;;  %v493_v6 = vadd.f32 1.0, %v477_v4  ;;  %v492_v31 = vadd.f32 1.0, %v476_v26  ;;  %v869_v26 = vld [vmem:[#allocation13] sm:$0xff] }
 0x119   :  { %v431_v9 = vpop.xlane.xlu1 %430  ;;  %v548_v10 = vmul.f32 %v1762_v56, %v532_v2  ;;  %v429_v11 = vpop.xlane.xlu0 %428  ;;  %v517_v12 = vmul.f32 %v1766_v5, %v485_v39  ;;  %v534_v24 = vsub.f32 2.0, %v518_v13 }
 0x11a   :  { %v1768_v14 = vpop.eup %1767  ;;  %v447_v15 = vadd.f32 %v431_v9, %v399_v1  ;;  %v446_v16 = vadd.f32 %v429_v11, %v398_v3  ;;  %1773 = vrcp.f32 %v493_v6 }
 0x11b   :  { %582 = vperm.xlu0 %1759, %v548_v10   ;;  %v533_v17 = vsub.f32 2.0, %v517_v12  ;;  %v479_v18 = vld [vmem:[#allocation3 + $0x58] sm:$0xff]  ;;  %1775 = vrcp.f32 %v2188_v7  ;;  %v519_v25 = vmul.f32 %v1768_v14, %v2173_v40  ;;  %v550_v32 = vmul.f32 %v1764_v62, %v534_v24  ;;  %v478_v35 = vld [vmem:[#allocation3 + $0x50] sm:$0xff] }
 0x11c   :  { %464 = vst.msk [vmem:[#allocation3 + $0x78] sm:$0xff] %vm126_vm0, %v447_v15  ;;  %463 = vst.msk [vmem:[#allocation3 + $0x70] sm:$0xff] %vm126_vm0, %v446_v16  ;;  %v495_v21 = vadd.f32 1.0, %v479_v18  ;;  %v1770_v28 = vpop.eup %1769  ;;  %v494_v39 = vadd.f32 1.0, %v478_v35  ;;  %v875_v35 = vld [vmem:[#allocation13 + $0x30] sm:$0xff] }
 0x11d   :  { %v549_v23 = vmul.f32 %v1766_v5, %v533_v17  ;;  %v535_v33 = vsub.f32 2.0, %v519_v25  ;;  %v520_v34 = vmul.f32 %v1770_v28, %v2178_v48  ;;  %v1772_v36 = vpop.eup %1771 }
 0x11e   :  { %1777 = vrcp.f32 %v495_v21  ;;  %v521_v43 = vmul.f32 %v1772_v36, %v2183_v57 }
 0x11f   :  { %587 = vperm.xlu1 %1760, %v549_v23   ;;  %v481_v29 = vld [vmem:[#allocation3 + $0x68] sm:$0xff]  ;;  %1779 = vrcp.f32 %v491_v19  ;;  %v551_v41 = vmul.f32 %v1768_v14, %v535_v33  ;;  %v536_v42 = vsub.f32 2.0, %v520_v34  ;;  %v480_v44 = vld [vmem:[#allocation3 + $0x60] sm:$0xff] }
 0x120   :  { %v497_v30 = vadd.f32 1.0, %v481_v29  ;;  %v496_v49 = vadd.f32 1.0, %v480_v44  ;;  %v537_v52 = vsub.f32 2.0, %v521_v43  ;;  %v1666_v29 = vpack.c.bf16 %v870_v27, %v869_v26  ;;  %v874_v33 = vld [vmem:[#allocation13 + $0x28] sm:$0xff]  ;;  %v881_v44 = vld [vmem:[#allocation13 + $0x60] sm:$0xff] }
 0x121   :  { %v552_v51 = vmul.f32 %v1770_v28, %v536_v42  ;;  %v871_v28 = vld [vmem:[#allocation13 + $0x10] sm:$0xff]  ;;  %v880_v42 = vld [vmem:[#allocation13 + $0x58] sm:$0xff] }
 0x122   :  { %1781 = vrcp.f32 %v497_v30  ;;  %v553_v61 = vmul.f32 %v1772_v36, %v537_v52  ;;  %1667 = vmatprep.subr.bf16.mxu0 %v1666_v29  ;;  %v876_v36 = vld [vmem:[#allocation13 + $0x38] sm:$0xff] }
 0x123   :  { %592 = vperm.xlu1 %1760, %v550_v32   ;;  %v483_v37 = vld [vmem:[#allocation3 + $0x78] sm:$0xff]  ;;  %1783 = vrcp.f32 %v492_v31  ;;  %v482_v55 = vld [vmem:[#allocation3 + $0x70] sm:$0xff]  ;;  %v873_v32 = vld [vmem:[#allocation13 + $0x20] sm:$0xff]  ;;  %1669 = vmatpush3.bf16.msra.mxu0 %v1666_v29 }
 0x124   :  { %v499_v38 = vadd.f32 1.0, %v483_v37  ;;  %v1774_v40 = vpop.eup %1773  ;;  %v498_v60 = vadd.f32 1.0, %v482_v55  ;;  %v1674_v34 = vpack.c.bf16 %v874_v33, %v873_v32  ;;  %v1678_v37 = vpack.c.bf16 %v876_v36, %v875_v35  ;;  %v854_v35 = vld [vmem:[#allocation12 + $0x8] sm:$0xff] }
 0x125   :  { %v1776_v45 = vpop.eup %1775  ;;  %v525_v46 = vmul.f32 %v1774_v40, %v493_v6 }
 0x126   :  { %1785 = vrcp.f32 %v499_v38  ;;  %v522_v54 = vmul.f32 %v1776_v45, %v2188_v7 }
 0x127   :  { %597 = vperm.xlu1 %1760, %v551_v41   ;;  %v541_v48 = vsub.f32 2.0, %v525_v46  ;;  %1787 = vrcp.f32 %v494_v39  ;;  %v879_v41 = vld [vmem:[#allocation13 + $0x50] sm:$0xff] }
 0x128   :  { %v1778_v47 = vpop.eup %1777  ;;  %1789 = vrcp.f32 %v496_v49  ;;  %v538_v63 = vsub.f32 2.0, %v522_v54  ;;  %v1686_v43 = vpack.c.bf16 %v880_v42, %v879_v41  ;;  %v857_v42 = vld [vmem:[#allocation12 + $0x20] sm:$0xff] }
 0x129   :  { %v1780_v50 = vpop.eup %1779  ;;  %v527_v53 = vmul.f32 %v1778_v47, %v495_v21  ;;  %v557_v56 = vmul.f32 %v1774_v40, %v541_v48  ;;  %1791 = vrcp.f32 %v498_v60  ;;  %v884_v48 = vld [vmem:[#allocation13 + $0x78] sm:$0xff] }
 0x12a   :  { %v523_v59 = vmul.f32 %v1780_v50, %v491_v19  ;;  %v554_v5 = vmul.f32 %v1776_v45, %v538_v63  ;;  %v882_v45 = vld [vmem:[#allocation13 + $0x68] sm:$0xff] }
 0x12b   :  { %602 = vperm.xlu1 %1760, %v552_v51   ;;  %v543_v58 = vsub.f32 2.0, %v527_v53  ;;  %627 = vperm.xlu0 %1759, %v557_v56   ;;  %v1690_v46 = vpack.c.bf16 %v882_v45, %v881_v44  ;;  %v859_v45 = vld [vmem:[#allocation12 + $0x30] sm:$0xff] }
 0x12c   :  { %v1782_v57 = vpop.eup %1781  ;;  %v539_v4 = vsub.f32 2.0, %v523_v59 }
 0x12d   :  { %v559_v62 = vmul.f32 %v1778_v47, %v543_v58  ;;  %v529_v0 = vmul.f32 %v1782_v57, %v497_v30  ;;  %v1784_v1 = vpop.eup %1783  ;;  %v872_v30 = vld [vmem:[#allocation13 + $0x18] sm:$0xff]  ;;  %v883_v47 = vld [vmem:[#allocation13 + $0x70] sm:$0xff] }
 0x12e   :  { %v524_v8 = vmul.f32 %v1784_v1, %v492_v31  ;;  %v555_v11 = vmul.f32 %v1780_v50, %v539_v4  ;;  %v1670_v31 = vpack.c.bf16 %v872_v30, %v871_v28 }
 0x12f   :  { %607 = vperm.xlu1 %1760, %v553_v61   ;;  %v545_v2 = vsub.f32 2.0, %v529_v0  ;;  %637 = vperm.xlu0 %1759, %v559_v62  }
 0x130   :  { %v1786_v3 = vpop.eup %1785  ;;  %v540_v13 = vsub.f32 2.0, %v524_v8  ;;  %1671 = vmatprep.subr.bf16.mxu0 %v1670_v31 }
 0x131   :  { %v561_v6 = vmul.f32 %v1782_v57, %v545_v2  ;;  %v531_v7 = vmul.f32 %v1786_v3, %v499_v38  ;;  %v1788_v9 = vpop.eup %1787  ;;  %1673 = vmatpush3.bf16.msra.mxu0 %v1670_v31  ;;  %v877_v38 = vld [vmem:[#allocation13 + $0x40] sm:$0xff] }
 0x132   :  { %v526_v14 = vmul.f32 %v1788_v9, %v494_v39  ;;  %v1790_v15 = vpop.eup %1789  ;;  %v556_v16 = vmul.f32 %v1784_v1, %v540_v13  ;;  %1675 = vmatprep.subr.bf16.mxu0 %v1674_v34  ;;  %v878_v39 = vld [vmem:[#allocation13 + $0x48] sm:$0xff] }
 0x133   :  { %612 = vperm.xlu1 %1760, %v554_v5   ;;  %v547_v10 = vsub.f32 2.0, %v531_v7  ;;  %647 = vperm.xlu0 %1759, %v561_v6   ;;  %v528_v18 = vmul.f32 %v1790_v15, %v496_v49  ;;  %v1792_v19 = vpop.eup %1791  ;;  %v1682_v40 = vpack.c.bf16 %v878_v39, %v877_v38  ;;  %v1694_v49 = vpack.c.bf16 %v884_v48, %v883_v47  ;;  %v856_v38 = vld [vmem:[#allocation12 + $0x18] sm:$0xff] }
 0x134   :  { %v542_v17 = vsub.f32 2.0, %v526_v14  ;;  %v530_v22 = vmul.f32 %v1792_v19, %v498_v60 }
 0x135   :  { %v563_v12 = vmul.f32 %v1786_v3, %v547_v10  ;;  %v544_v21 = vsub.f32 2.0, %v528_v18  ;;  %1677 = vmatpush3.bf16.msra.mxu0 %v1674_v34  ;;  %v853_v34 = vld [vmem:[#allocation12] sm:$0xff] }
 0x136   :  { %v558_v20 = vmul.f32 %v1788_v9, %v542_v17  ;;  %v546_v24 = vsub.f32 2.0, %v530_v22  ;;  %1679 = vmatprep.subr.bf16.mxu0 %v1678_v37  ;;  %v1698_v36 = vpack.c.bf16 %v854_v35, %v853_v34 }
 0x137   :  { %617 = vperm.xlu1 %1760, %v555_v11   ;;  %657 = vperm.xlu0 %1759, %v563_v12   ;;  %v560_v23 = vmul.f32 %v1790_v15, %v544_v21 }
 0x138   :  { %v562_v25 = vmul.f32 %v1792_v19, %v546_v24 }
 0x139   :  { %1681 = vmatpush3.bf16.msra.mxu0 %v1678_v37  ;;  %v855_v37 = vld [vmem:[#allocation12 + $0x10] sm:$0xff] }
 0x13a   :  { %1683 = vmatprep.subr.bf16.mxu0 %v1682_v40  ;;  %v1702_v41 = vpack.c.bf16 %v856_v38, %v855_v37 }
 0x13b   :  { %622 = vperm.xlu1 %1760, %v556_v16  }
 0x13d   :  { %1685 = vmatpush3.bf16.msra.mxu0 %v1682_v40 }
 0x13e   :  { %1687 = vmatprep.subr.bf16.mxu0 %v1686_v43 }
 0x13f   :  { %632 = vperm.xlu1 %1760, %v558_v20  }
 0x141   :  { %1689 = vmatpush3.bf16.msra.mxu0 %v1686_v43  ;;  %v858_v43 = vld [vmem:[#allocation12 + $0x28] sm:$0xff] }
 0x142   :  { %1691 = vmatprep.subr.bf16.mxu0 %v1690_v46  ;;  %v1706_v44 = vpack.c.bf16 %v858_v43, %v857_v42 }
 0x143   :  { %642 = vperm.xlu1 %1760, %v560_v23  }
 0x145   :  { %1693 = vmatpush3.bf16.msra.mxu0 %v1690_v46  ;;  %v860_v46 = vld [vmem:[#allocation12 + $0x38] sm:$0xff] }
 0x146   :  { %1695 = vmatprep.subr.bf16.mxu0 %v1694_v49 }
 0x147   :  { %652 = vperm.xlu1 %1760, %v562_v25  }
 0x149   :  { %1697 = vmatpush3.bf16.msra.mxu0 %v1694_v49  ;;  %v1710_v49 = vpack.c.bf16 %v860_v46, %v859_v45 }
 0x14a   :  { %1699 = vmatprep.subr.bf16.mxu0 %v1698_v36 }
 0x164   :  { %v1412_v50 = vpop.f32.mrb[0].mxu1 }
 0x165   :  { %v273_v51 = vpop.f32.mrb[1].mxu1 }
 0x168   :  { %v1415_v52 = vpop.f32.mrb[2].mxu1 }
 0x169   :  { %v283_v53 = vpop.f32.mrb[3].mxu1 }
 0x16c   :  { %v1418_v54 = vpop.f32.mrb[4].mxu1 }
 0x16d   :  { %v293_v55 = vpop.f32.mrb[5].mxu1 }
 0x170   :  { %v1421_v56 = vpop.f32.mrb[6].mxu1 }
 0x171   :  { %v303_v58 = vpop.f32.mrb[7].mxu1 }
 0x174   :  { %v1424_v57 = vpop.f32.mrb[8].mxu1 }
 0x175   :  { %v313_v59 = vpop.f32.mrb[9].mxu1 }
 0x178   :  { %v1427_v60 = vpop.f32.mrb[10].mxu1 }
 0x179   :  { %v323_v61 = vpop.f32.mrb[11].mxu1 }
 0x17c   :  { %v1430_v62 = vpop.f32.mrb[12].mxu1 }
 0x17d   :  { %v333_v63 = vpop.f32.mrb[13].mxu1 }
 0x180   :  { %v1433_v0 = vpop.f32.mrb[14].mxu1 }
 0x181   :  { %v343_v1 = vpop.f32.mrb[15].mxu1 }
 0x19a   :  { %v583_v2 = vpop.permute.xlu0 %582 }
 0x19b   :  { %v660_v3 = vmul.f32 %v583_v2, %v273_v51  ;;  %v862_v51 = vld [vmem:[#allocation12 + $0x48] sm:$0xff] }
 0x19d   :  { %1466 = vmatprep.mubr.f32.mxu1 %v660_v3 }
 0x19e   :  { %v588_v4 = vpop.permute.xlu1 %587 }
 0x19f   :  { %v661_v5 = vmul.f32 %v1412_v50, %v588_v4  ;;  %v861_v50 = vld [vmem:[#allocation12 + $0x40] sm:$0xff] }
 0x1a1   :  { %1467 = vmatmul.mubr.f32.vlgmr.msra.gmra.mrb[16].mxu1 %v661_v5 }
 0x1a2   :  { %v593_v6 = vpop.permute.xlu1 %592 }
 0x1a3   :  { %v662_v7 = vmul.f32 %v593_v6, %v283_v53  ;;  %v863_v53 = vld [vmem:[#allocation12 + $0x50] sm:$0xff] }
 0x1a5   :  { %1469 = vmatprep.mubr.f32.mxu1 %v662_v7 }
 0x1a6   :  { %v598_v8 = vpop.permute.xlu1 %597 }
 0x1a7   :  { %v663_v9 = vmul.f32 %v1415_v52, %v598_v8  ;;  %v1714_v52 = vpack.c.bf16 %v862_v51, %v861_v50 }
 0x1a9   :  { %1470 = vmatmul.mubr.f32.gmra.mrb[18].mxu1 %v663_v9 }
 0x1aa   :  { %v603_v10 = vpop.permute.xlu1 %602  ;;  %v628_v15 = vpop.permute.xlu0 %627 }
 0x1ab   :  { %v664_v11 = vmul.f32 %v603_v10, %v293_v55  ;;  %v669_v22 = vmul.f32 %v1424_v57, %v628_v15  ;;  %v865_v57 = vld [vmem:[#allocation12 + $0x60] sm:$0xff]  ;;  %v842_v15 = vld [vmem:[#allocation4 + $0x28] sm:$0xff] }
 0x1ac   :  { %v837_v10 = vld [vmem:[#allocation4] sm:$0xff] }
 0x1ad   :  { %1472 = vmatprep.mubr.f32.mxu1 %v664_v11  ;;  %v838_v11 = vld [vmem:[#allocation4 + $0x8] sm:$0xff] }
 0x1ae   :  { %v608_v12 = vpop.permute.xlu1 %607  ;;  %v638_v19 = vpop.permute.xlu0 %637 }
 0x1af   :  { %v665_v13 = vmul.f32 %v1418_v54, %v608_v12  ;;  %v671_v26 = vmul.f32 %v1427_v60, %v638_v19  ;;  %v864_v54 = vld [vmem:[#allocation12 + $0x58] sm:$0xff]  ;;  %v839_v12 = vld [vmem:[#allocation4 + $0x10] sm:$0xff]  ;;  %v846_v19 = vld [vmem:[#allocation4 + $0x48] sm:$0xff] }
 0x1b1   :  { %1473 = vmatmul.mubr.f32.gmra.mrb[20].mxu1 %v665_v13  ;;  %v840_v13 = vld [vmem:[#allocation4 + $0x18] sm:$0xff] }
 0x1b2   :  { %v613_v14 = vpop.permute.xlu1 %612  ;;  %v648_v24 = vpop.permute.xlu0 %647 }
 0x1b3   :  { %v666_v16 = vmul.f32 %v613_v14, %v303_v58  ;;  %v673_v29 = vmul.f32 %v1430_v62, %v648_v24  ;;  %v1718_v58 = vpack.c.bf16 %v864_v54, %v863_v53  ;;  %v868_v62 = vld [vmem:[#allocation12 + $0x78] sm:$0xff]  ;;  %v841_v14 = vld [vmem:[#allocation4 + $0x20] sm:$0xff]  ;;  %v851_v24 = vld [vmem:[#allocation4 + $0x70] sm:$0xff] }
 0x1b5   :  { %1475 = vmatprep.mubr.f32.mxu1 %v666_v16  ;;  %v843_v16 = vld [vmem:[#allocation4 + $0x30] sm:$0xff] }
 0x1b6   :  { %v618_v17 = vpop.permute.xlu1 %617  ;;  %v658_v30 = vpop.permute.xlu0 %657 }
 0x1b7   :  { %v667_v18 = vmul.f32 %v1421_v56, %v618_v17  ;;  %v675_v33 = vmul.f32 %v1433_v0, %v658_v30  ;;  %v844_v17 = vld [vmem:[#allocation4 + $0x38] sm:$0xff] }
 0x1b9   :  { %1476 = vmatmul.mubr.f32.gmra.mrb[22].mxu1 %v667_v18  ;;  %v845_v18 = vld [vmem:[#allocation4 + $0x40] sm:$0xff] }
 0x1ba   :  { %v623_v20 = vpop.permute.xlu1 %622 }
 0x1bb   :  { %v668_v21 = vmul.f32 %v623_v20, %v313_v59  ;;  %v866_v59 = vld [vmem:[#allocation12 + $0x68] sm:$0xff]  ;;  %v847_v20 = vld [vmem:[#allocation4 + $0x50] sm:$0xff] }
 0x1bc   :  { %v1722_v60 = vpack.c.bf16 %v866_v59, %v865_v57 }
 0x1bd   :  { %1478 = vmatprep.mubr.f32.mxu1 %v668_v21  ;;  %v848_v21 = vld [vmem:[#allocation4 + $0x58] sm:$0xff] }
 0x1be   :  { %v633_v23 = vpop.permute.xlu1 %632  ;;  %1479 = vmatmul.mubr.f32.gmra.mrb[24].mxu1 %v669_v22  ;;  %v849_v22 = vld [vmem:[#allocation4 + $0x60] sm:$0xff] }
 0x1bf   :  { %v670_v25 = vmul.f32 %v633_v23, %v323_v61  ;;  %v867_v61 = vld [vmem:[#allocation12 + $0x70] sm:$0xff]  ;;  %v850_v23 = vld [vmem:[#allocation4 + $0x68] sm:$0xff] }
 0x1c1   :  { %1481 = vmatprep.mubr.f32.mxu1 %v670_v25  ;;  %v852_v25 = vld [vmem:[#allocation4 + $0x78] sm:$0xff] }
 0x1c2   :  { %v643_v27 = vpop.permute.xlu1 %642  ;;  %1482 = vmatmul.mubr.f32.gmra.mrb[26].mxu1 %v671_v26 }
 0x1c3   :  { %v672_v28 = vmul.f32 %v643_v27, %v333_v63 }
 0x1c5   :  { %1484 = vmatprep.mubr.f32.mxu1 %v672_v28 }
 0x1c6   :  { %v653_v31 = vpop.permute.xlu1 %652  ;;  %1485 = vmatmul.mubr.f32.gmra.mrb[28].mxu1 %v673_v29 }
 0x1c7   :  { %v674_v32 = vmul.f32 %v653_v31, %v343_v1  ;;  %v1726_v1 = vpack.c.bf16 %v868_v62, %v867_v61 }
 0x1c9   :  { %1487 = vmatprep.mubr.f32.mxu1 %v674_v32 }
 0x1ca   :  { %1488 = vmatmul.mubr.f32.gmra.mrb[30].mxu1 %v675_v33 }
 0x274   :  { %v1468_v39 = vpop.f32.mrb[16].mxu1 }
 0x275   :  { %v758_v40 = vpop.f32.mrb[17].mxu1 }
 0x276   :  { %1522 = vmatprep.mubr.f32.mxu0 %v758_v40 }
 0x277   :  { %1523 = vmatmul.mubr.f32.vlgmr.msra.gmra.mrb[0].mxu0 %v1468_v39 }
 0x278   :  { %1701 = vmatpush3.bf16.msra.mxu0 %v1698_v36 }
 0x279   :  { %1703 = vmatprep.subr.bf16.mxu0 %v1702_v41 }
 0x27c   :  { %v1471_v47 = vpop.f32.mrb[18].mxu1  ;;  %1705 = vmatpush3.bf16.msra.mxu0 %v1702_v41 }
 0x27d   :  { %v768_v48 = vpop.f32.mrb[19].mxu1  ;;  %1707 = vmatprep.subr.bf16.mxu0 %v1706_v44 }
 0x27e   :  { %1525 = vmatprep.mubr.f32.mxu0 %v768_v48 }
 0x27f   :  { %1526 = vmatmul.mubr.f32.gmra.mrb[2].mxu0 %v1471_v47 }
 0x280   :  { %1709 = vmatpush3.bf16.msra.mxu0 %v1706_v44 }
 0x281   :  { %1711 = vmatprep.subr.bf16.mxu0 %v1710_v49 }
 0x284   :  { %v1474_v55 = vpop.f32.mrb[20].mxu1  ;;  %1713 = vmatpush3.bf16.msra.mxu0 %v1710_v49 }
 0x285   :  { %v778_v56 = vpop.f32.mrb[21].mxu1  ;;  %1715 = vmatprep.subr.bf16.mxu0 %v1714_v52 }
 0x286   :  { %1528 = vmatprep.mubr.f32.mxu0 %v778_v56 }
 0x287   :  { %1529 = vmatmul.mubr.f32.gmra.mrb[4].mxu0 %v1474_v55 }
 0x288   :  { %1717 = vmatpush3.bf16.msra.mxu0 %v1714_v52 }
 0x289   :  { %1719 = vmatprep.subr.bf16.mxu0 %v1718_v58 }
 0x28c   :  { %v1477_v63 = vpop.f32.mrb[22].mxu1  ;;  %1721 = vmatpush3.bf16.msra.mxu0 %v1718_v58 }
 0x28d   :  { %v788_v0 = vpop.f32.mrb[23].mxu1  ;;  %1723 = vmatprep.subr.bf16.mxu0 %v1722_v60 }
 0x28e   :  { %1531 = vmatprep.mubr.f32.mxu0 %v788_v0 }
 0x28f   :  { %1532 = vmatmul.mubr.f32.gmra.mrb[6].mxu0 %v1477_v63 }
 0x290   :  { %1725 = vmatpush3.bf16.msra.mxu0 %v1722_v60 }
 0x291   :  { %v1480_v2 = vpop.f32.mrb[24].mxu1  ;;  %1727 = vmatprep.subr.bf16.mxu0 %v1726_v1 }
 0x292   :  { %v798_v3 = vpop.f32.mrb[25].mxu1 }
 0x293   :  { %1534 = vmatprep.mubr.f32.mxu0 %v798_v3 }
 0x294   :  { %1535 = vmatmul.mubr.f32.gmra.mrb[8].mxu0 %v1480_v2 }
 0x295   :  { %v1483_v4 = vpop.f32.mrb[26].mxu1  ;;  %1729 = vmatpush3.bf16.msra.mxu0 %v1726_v1 }
 0x296   :  { %v808_v5 = vpop.f32.mrb[27].mxu1 }
 0x297   :  { %1537 = vmatprep.mubr.f32.mxu0 %v808_v5 }
 0x298   :  { %1538 = vmatmul.mubr.f32.gmra.mrb[10].mxu0 %v1483_v4 }
 0x299   :  { %v1486_v6 = vpop.f32.mrb[28].mxu1 }
 0x29a   :  { %v818_v7 = vpop.f32.mrb[29].mxu1 }
 0x29b   :  { %1540 = vmatprep.mubr.f32.mxu0 %v818_v7 }
 0x29c   :  { %1541 = vmatmul.mubr.f32.gmra.mrb[12].mxu0 %v1486_v6 }
 0x29d   :  { %v1489_v8 = vpop.f32.mrb[30].mxu1 }
 0x29e   :  { %v828_v9 = vpop.f32.mrb[31].mxu1 }
 0x29f   :  { %1543 = vmatprep.mubr.f32.mxu0 %v828_v9 }
 0x2a0   :  { %1544 = vmatmul.mubr.f32.gmra.mrb[14].mxu0 %v1489_v8 }
 0x2a1   :  { %1578 = vmatprep.mubr.f32.mxu0 %v837_v10 }
 0x2a4   :  { %1579 = vmatmul.mubr.f32.vlgmr.msra.gmra.mrb[0].mxu0 %v838_v11 }
 0x2a5   :  { %1581 = vmatprep.mubr.f32.mxu0 %v839_v12 }
 0x2a8   :  { %1582 = vmatmul.mubr.f32.gmra.mrb[2].mxu0 %v840_v13 }
 0x2a9   :  { %1584 = vmatprep.mubr.f32.mxu0 %v841_v14 }
 0x2ac   :  { %1585 = vmatmul.mubr.f32.gmra.mrb[4].mxu0 %v842_v15 }
 0x2ad   :  { %1587 = vmatprep.mubr.f32.mxu0 %v843_v16 }
 0x2b0   :  { %1588 = vmatmul.mubr.f32.gmra.mrb[6].mxu0 %v844_v17 }
 0x2b1   :  { %1590 = vmatprep.mubr.f32.mxu0 %v845_v18 }
 0x2b4   :  { %1591 = vmatmul.mubr.f32.gmra.mrb[8].mxu0 %v846_v19 }
 0x2b5   :  { %1593 = vmatprep.mubr.f32.mxu0 %v847_v20 }
 0x2b8   :  { %1594 = vmatmul.mubr.f32.gmra.mrb[10].mxu0 %v848_v21 }
 0x2b9   :  { %1596 = vmatprep.mubr.f32.mxu0 %v849_v22 }
 0x2bc   :  { %1597 = vmatmul.mubr.f32.gmra.mrb[12].mxu0 %v850_v23 }
 0x2bd   :  { %1599 = vmatprep.mubr.f32.mxu0 %v851_v24 }
 0x2c0   :  { %1600 = vmatmul.mubr.f32.gmra.mrb[14].mxu0 %v852_v25 }
 0x377   :  { %v1580_v26 = vpop.f32.mrb[0].mxu0 }
 0x378   :  { %1176 = vst [vmem:[#allocation15 + $0x8] sm:$0xff] %v1580_v26  ;;  %v1096_v27 = vpop.f32.mrb[1].mxu0 }
 0x379   :  { %1175 = vst [vmem:[#allocation15] sm:$0xff] %v1096_v27 }
 0x37b   :  { %v1583_v28 = vpop.f32.mrb[2].mxu0 }
 0x37c   :  { %1178 = vst [vmem:[#allocation15 + $0x18] sm:$0xff] %v1583_v28  ;;  %v1106_v29 = vpop.f32.mrb[3].mxu0 }
 0x37d   :  { %1177 = vst [vmem:[#allocation15 + $0x10] sm:$0xff] %v1106_v29 }
 0x37f   :  { %v1586_v30 = vpop.f32.mrb[4].mxu0 }
 0x380   :  { %1180 = vst [vmem:[#allocation15 + $0x28] sm:$0xff] %v1586_v30  ;;  %v1116_v31 = vpop.f32.mrb[5].mxu0 }
 0x381   :  { %1179 = vst [vmem:[#allocation15 + $0x20] sm:$0xff] %v1116_v31 }
 0x383   :  { %v1589_v32 = vpop.f32.mrb[6].mxu0 }
 0x384   :  { %1182 = vst [vmem:[#allocation15 + $0x38] sm:$0xff] %v1589_v32  ;;  %v1126_v33 = vpop.f32.mrb[7].mxu0 }
 0x385   :  { %1181 = vst [vmem:[#allocation15 + $0x30] sm:$0xff] %v1126_v33 }
 0x387   :  { %v1592_v34 = vpop.f32.mrb[8].mxu0 }
 0x388   :  { %1184 = vst [vmem:[#allocation15 + $0x48] sm:$0xff] %v1592_v34  ;;  %v1136_v35 = vpop.f32.mrb[9].mxu0 }
 0x389   :  { %1183 = vst [vmem:[#allocation15 + $0x40] sm:$0xff] %v1136_v35 }
 0x38b   :  { %v1595_v36 = vpop.f32.mrb[10].mxu0 }
 0x38c   :  { %1186 = vst [vmem:[#allocation15 + $0x58] sm:$0xff] %v1595_v36  ;;  %v1146_v37 = vpop.f32.mrb[11].mxu0 }
 0x38d   :  { %1185 = vst [vmem:[#allocation15 + $0x50] sm:$0xff] %v1146_v37 }
 0x38f   :  { %v1598_v38 = vpop.f32.mrb[12].mxu0 }
 0x390   :  { %1188 = vst [vmem:[#allocation15 + $0x68] sm:$0xff] %v1598_v38  ;;  %v1156_v39 = vpop.f32.mrb[13].mxu0 }
 0x391   :  { %1187 = vst [vmem:[#allocation15 + $0x60] sm:$0xff] %v1156_v39 }
 0x393   :  { %v1601_v40 = vpop.f32.mrb[14].mxu0 }
 0x394   :  { %1190 = vst [vmem:[#allocation15 + $0x78] sm:$0xff] %v1601_v40  ;;  %v1166_v41 = vpop.f32.mrb[15].mxu0 }
 0x395   :  { %1189 = vst [vmem:[#allocation15 + $0x70] sm:$0xff] %v1166_v41 }
 0x396   :  { %1936 = shalt.err (!%p1933_p10)
}
 0x397   :  { %s1937_s25 = scalar_lea.hbm %s2218_s6, 2048 }
 0x398   :  { %p1938_p11 = scmp.ne.s32.totalorder %s2218_s6, %s1937_s25  ;;  %p1941_p12 = scmp.lt.u32.totalorder %s1937_s25, %s2218_s6 }
 0x39a   :  { %p1943_p13 = pnand %p1941_p12, %p1938_p11 }
 0x39c   :  { %1946 = shalt.err (!%p1943_p13)
}
 0x39d   :  { %1202 = dma.vmem_to_hbm [thread:$0]  %s1197_s1, 2048, %s2218_s6, [#allocation6], %s1959_s9, %s1959_s9, %s1960_s10  }
 0x39e   :  { %1955 = dma.done.wait [#allocation6], 2048  }
 0x39f   :  { %1956 = vsyncadd [#allocation6], 4294965248 }
 0x3a0   :  { %1206 = vsyncpa [#allocation5], 1 }
 0x3a1   :  { %1207 = vsyncpa [#allocation8], 1 }
 0x3a2   :  { %1208 = vsyncpa [#allocation11], 1 }
 0x3a3   :  { %1209 = vsyncpa [#allocation14], 1 }
 0x3a4   :  { %1210 = vsyncpa [#allocation6], 1 }

</bundles_post_ra>
